<compile_context>
chip_gen: v6e
topology: v6e:2x2x1
jax: 0.10.0
libtpu: 0.0.40
codegen_flags: <defaults>
</compile_context>

<pallas_src>
import numpy as np
import jax
import jax.numpy as jnp
from jax import lax
from jax.experimental import pallas as pl
from jax.experimental.pallas import tpu as pltpu

_MIB = 1024 * 1024


# --------------------------------------------------------------------------- #
# Host-side interpolation matrices / threshold algebra
# --------------------------------------------------------------------------- #
def _bilinear_matrix(in_size: int, out_size: int) -> np.ndarray:
    """W s.t. out = W @ in reproduces F.interpolate(mode='bilinear',
    align_corners=False) along one axis."""
    scale = in_size / out_size
    dst = np.arange(out_size)
    src = (dst + 0.5) * scale - 0.5
    src = np.clip(src, 0.0, None)                # PyTorch clamps negative src to 0
    i0 = np.minimum(np.floor(src).astype(np.int64), in_size - 1)
    i1 = np.minimum(i0 + 1, in_size - 1)
    l1 = (src - i0).astype(np.float32)
    l0 = (1.0 - l1).astype(np.float32)
    w = np.zeros((out_size, in_size), dtype=np.float32)
    w[dst, i0] += l0
    w[dst, i1] += l1
    return w


def _logit(threshold: float) -> float:
    """sigmoid(x) > t  <=>  x > logit(t)  (sigmoid is monotone)."""
    if threshold <= 0.0:
        return float("-inf")
    if threshold >= 1.0:
        return float("inf")
    return float(np.log(threshold / (1.0 - threshold)))


# --------------------------------------------------------------------------- #
# Sizing helpers
# --------------------------------------------------------------------------- #
def _vmem_limit_bytes() -> int:
    """Scoped-VMEM limit per chip: physical minus 32 MiB headroom, clamped to
    [32, 100] MiB.  v5e/v6e (128 MiB phys) -> 96 MiB, v7x (64 MiB phys) -> 32 MiB."""
    try:
        phys = int(pltpu.get_tpu_info().vmem_capacity_bytes)
    except Exception:        # no TPU info available: be conservative (v7x-safe)
        phys = 64 * _MIB
    return int(max(32 * _MIB, min(phys - 32 * _MIB, 100 * _MIB)))


def _rup(x: int, m: int) -> int:
    return -(-x // m) * m


def _mxu_cost(m: int, k: int, n: int, tile: int = 256) -> int:
    """Padded-MXU work proxy for an (m,k)x(k,n) GEMM: K/N rounded to the MXU tile,
    M to the 8-sublane feed.  TODO(synk): tile=128 on v5e; re-sweep order/nb there."""
    return _rup(m, 8) * _rup(k, tile) * _rup(n, tile)


def _choose_nb(n, h_in, w_in, h_out, w_out, wy_bytes, wxt_bytes, t_bytes,
               vmem_limit, min_grid_steps=4):
    """Masks per grid step.  Fits a conservative fraction of the scoped VMEM
    (double-buffered in/out blocks + resident matrices + in-flight tiles), keeps
    >= min_grid_steps grid steps (>= 2 per v7x TensorCore so DMA pipelines), and
    is a divisor of n so the output needs neither padding nor a post-slice."""
    per_mask = 2 * 2 * h_in * w_in + 2 * 1 * h_out * w_out     # bf16 in + i8 out, x2 bufs
    const = (2 * (wy_bytes + wxt_bytes)                        # interp matrices (2 bufs)
             + t_bytes * max(h_in, h_out) * max(w_in, w_out)   # in-flight intermediate
             + 4 * h_out * w_out                               # f32 logits tile
             + 1 * _MIB)                                       # slack
    budget = int(vmem_limit * 0.75) - const
    cap = max(1, budget // per_mask)
    cap = min(cap, max(1, -(-n // min_grid_steps)), n)         # clamp AFTER everything
    nb = 1
    for d in range(1, int(cap) + 1):                           # largest divisor of n <= cap
        if n % d == 0:
            nb = d
    return int(nb)


# --------------------------------------------------------------------------- #
# Kernel
# --------------------------------------------------------------------------- #
def _make_kernel(logit_thr, nb, width_first, t_dtype):
    """One grid step over a block of `nb` masks.

    m_ref   : (nb, h_in,  w_in)   bf16
    wy_ref  : (h_out, h_in)       composed row-interp matrix
    wxt_ref : (w_in,  w_out)      composed col-interp matrix (transposed)
    out_ref : (nb, h_out, w_out)  int8 in {0, 1}
    """

    def kernel(m_ref, wy_ref, wxt_ref, out_ref):
        wy = wy_ref[...]                 # hoisted once per grid step
        wxt = wxt_ref[...]

        def body(b, carry):
            m = m_ref[b]                                          # (h_in, w_in)
            if width_first:
                t = jnp.dot(m, wxt, preferred_element_type=jnp.float32)
                logits = jnp.dot(wy, t.astype(t_dtype),
                                 preferred_element_type=jnp.float32)
            else:
                t = jnp.dot(wy, m, preferred_element_type=jnp.float32)
                logits = jnp.dot(t.astype(t_dtype), wxt,
                                 preferred_element_type=jnp.float32)
            # Threshold fused right after the GEMM; no extra elementwise epilogue.
            out_ref[b] = (logits > logit_thr).astype(jnp.int8)
            return carry

        lax.fori_loop(0, nb, body, 0, unroll=min(2, nb))

    return kernel


def _resize_threshold_int8(masks3d, wy, wxt, logit_thr, nb, width_first, t_dtype,
                           vmem_limit):
    n, h_in, w_in = masks3d.shape
    h_out = wy.shape[0]
    w_out = wxt.shape[1]
    grid = (n // nb,)

    if width_first:
        flops = 2 * n * (h_in * w_in * w_out + h_out * h_in * w_out)
    else:
        flops = 2 * n * (h_out * h_in * w_in + h_out * w_in * w_out)
    # wy/wxt have constant index maps but are still counted per grid step.
    bytes_accessed = (masks3d.size * masks3d.dtype.itemsize
                      + grid[0] * (wy.size * wy.dtype.itemsize
                                   + wxt.size * wxt.dtype.itemsize)
                      + n * h_out * w_out)

    # TODO(synk): pipeline_mode=pl.Buffered(1) on the constant wy/wxt specs would
    # drop their second VMEM buffer; kept on the default lowering path for safety.
    return pl.pallas_call(
        _make_kernel(logit_thr, nb, width_first, t_dtype),
        out_shape=jax.ShapeDtypeStruct((n, h_out, w_out), jnp.int8),
        grid=grid,
        in_specs=[
            pl.BlockSpec((nb, h_in, w_in), lambda i: (i, 0, 0)),
            pl.BlockSpec((h_out, h_in), lambda i: (0, 0)),
            pl.BlockSpec((w_in, w_out), lambda i: (0, 0)),
        ],
        out_specs=pl.BlockSpec((nb, h_out, w_out), lambda i: (i, 0, 0)),
        compiler_params=pltpu.CompilerParams(
            dimension_semantics=("parallel",),
            vmem_limit_bytes=vmem_limit,
        ),
        cost_estimate=pl.CostEstimate(
            flops=int(flops), transcendentals=0, bytes_accessed=int(bytes_accessed)),
    )(masks3d, wy, wxt)


# --------------------------------------------------------------------------- #
# Module-equivalent wrapper
# --------------------------------------------------------------------------- #
def post_process_segm(results, outputs, orig_target_sizes, max_target_sizes,
                      threshold=0.5):
    assert len(orig_target_sizes) == len(max_target_sizes)

    max_sizes_np = np.asarray(max_target_sizes)
    orig_sizes_np = np.asarray(orig_target_sizes)
    max_h, max_w = (int(v) for v in max_sizes_np.max(0))
    min_h, min_w = (int(v) for v in max_sizes_np.min(0))
    min_oh, min_ow = (int(v) for v in orig_sizes_np.min(0))
    max_oh, max_ow = (int(v) for v in orig_sizes_np.max(0))

    pred_masks = outputs["pred_masks"]                         # [B, Q, 1, H, W]
    b, q, _, h_in, w_in = pred_masks.shape

    if not (min_h == max_h and min_w == max_w and min_oh == max_oh and min_ow == max_ow):
        # TODO(synk): the per-image crop + per-image resize branch has data-dependent
        # output shapes and cannot be expressed as one static-shape Pallas call; only
        # the uniform-target-size fast path is implemented.
        raise NotImplementedError("Only the uniform-target-size branch is implemented.")

    h_out, w_out = min_oh, min_ow

    # Compose the two bilinear resizes (H,W)->(max_h,max_w)->(orig_h,orig_w) into one
    # matrix per axis.  Exact ONLY because bilinear (antialias=False) is linear.
    wy_np = _bilinear_matrix(max_h, h_out) @ _bilinear_matrix(h_in, max_h)   # (h_out, h_in)
    wx_np = _bilinear_matrix(max_w, w_out) @ _bilinear_matrix(w_in, max_w)   # (w_out, w_in)
    wxt_np = np.ascontiguousarray(wx_np.T)                                   # (w_in, w_out)

    # GEMM order picked by MXU-tile-padded work, not raw flops.
    width_first = (_mxu_cost(h_in, w_in, w_out) + _mxu_cost(h_out, h_in, w_out)
                   <= _mxu_cost(h_out, h_in, w_in) + _mxu_cost(h_out, w_in, w_out))
    # Keep the intermediate in f32 when the second GEMM's K is small (avoids flipping
    # pixels whose composed logit is ~0); bf16 otherwise for MXU rate / VMEM.
    k2 = h_in if width_first else w_in
    t_dtype = jnp.float32 if k2 <= 64 else jnp.bfloat16
    wy_dtype = t_dtype if width_first else jnp.bfloat16
    wxt_dtype = jnp.bfloat16 if width_first else t_dtype

    wy = jnp.asarray(wy_np, dtype=wy_dtype)
    wxt = jnp.asarray(wxt_np, dtype=wxt_dtype)

    vmem_limit = _vmem_limit_bytes()
    n = b * q
    nb = _choose_nb(n, h_in, w_in, h_out, w_out,
                    wy_bytes=wy.size * wy.dtype.itemsize,
                    wxt_bytes=wxt.size * wxt.dtype.itemsize,
                    t_bytes=np.dtype(t_dtype).itemsize,
                    vmem_limit=vmem_limit)

    masks3d = jnp.squeeze(pred_masks, axis=2).reshape(n, h_in, w_in).astype(jnp.bfloat16)

    out = _resize_threshold_int8(masks3d, wy, wxt, _logit(threshold),
                                 nb, width_first, t_dtype, vmem_limit)

    # Kernel output is exact-shape (no padding -> no slice); the only remaining post
    # pass is the int8 -> bool cast (the reshape is a free bitcast).
    # TODO(synk): emit jnp.bool_ directly from the kernel once bool memrefs are
    # guaranteed on the deployed Pallas version; that removes this pass as well.
    out = out.astype(jnp.bool_).reshape(b, q, 1, h_out, w_out)
    for i in range(b):
        results[i]["masks"] = out[i]                           # [Q, 1, orig_h, orig_w] bool
    return results


if __name__ == "__main__":
    key = jax.random.PRNGKey(0)
    B, Q, H, W = 2, 4, 16, 16
    pred_masks = jax.random.normal(key, (B, Q, 1, H, W), dtype=jnp.float32)

    max_target_sizes = jnp.array([[32, 32], [32, 32]], dtype=jnp.int32)
    orig_target_sizes = jnp.array([[64, 64], [64, 64]], dtype=jnp.int32)

    results = [{} for _ in range(B)]
    results = post_process_segm(
        results,
        {"pred_masks": pred_masks},
        orig_target_sizes,
        max_target_sizes,
        threshold=0.5,
    )

    for r in results:
        jax.block_until_ready(r["masks"])
        assert r["masks"].shape == (Q, 1, 64, 64)
        assert r["masks"].dtype == jnp.bool_

    # Reference: same composed matrices in f32, applied to the bf16-cast input
    # (matching the kernel's operand precision); sigmoid(x) > 0.5  <=>  x > 0.
    wy_ref = jnp.asarray(_bilinear_matrix(32, 64) @ _bilinear_matrix(16, 32))
    wx_ref = jnp.asarray(_bilinear_matrix(32, 64) @ _bilinear_matrix(16, 32))
    m = pred_masks[:, :, 0].astype(jnp.bfloat16).astype(jnp.float32)     # (B, Q, H, W)
    ref = jnp.einsum("oh,bqhw,pw->bqop", wy_ref, m, wx_ref) > 0.0
    got = jnp.stack([r["masks"][:, 0] for r in results])                 # (B, Q, 64, 64)
    mismatch = float(jnp.mean((got != ref).astype(jnp.float32)))
    assert mismatch < 0.02, f"mask mismatch fraction too high: {mismatch}"

    print("KERNEL_OK")
</pallas_src>

<mosaic_0001>
module attributes {stable_mosaic.version = 11 : i64} {
  func.func @kernel(%arg0: i32, %arg1: memref<2x16x16xbf16, #tpu.memory_space<vmem>>, %arg2: memref<64x16xf32, #tpu.memory_space<vmem>>, %arg3: memref<16x64xbf16, #tpu.memory_space<vmem>>, %arg4: memref<2x64x64xi8, #tpu.memory_space<vmem>>) attributes {dimension_semantics = [#tpu.dimension_semantics<parallel>], iteration_bounds = array<i64: 4>, scalar_prefetch = 0 : i64, scratch_operands = 0 : i64, tpu.core_type = #tpu.core_type<tc>, window_params = [{transform_indices = @transform_0, window_bounds = array<i64: 2, 16, 16>}, {pipeline_mode = #tpu.pipeline_mode<synchronous>, transform_indices = @transform_1, window_bounds = array<i64: 64, 16>}, {pipeline_mode = #tpu.pipeline_mode<synchronous>, transform_indices = @transform_2, window_bounds = array<i64: 16, 64>}, {transform_indices = @transform_3, window_bounds = array<i64: 2, 64, 64>}]} {
    %c0 = arith.constant 0 : index
    %c0_0 = arith.constant 0 : index
    %0 = vector.load %arg2[%c0, %c0_0] : memref<64x16xf32, #tpu.memory_space<vmem>>, vector<64x16xf32>
    %c0_1 = arith.constant 0 : index
    %c0_2 = arith.constant 0 : index
    %1 = vector.load %arg3[%c0_1, %c0_2] : memref<16x64xbf16, #tpu.memory_space<vmem>>, vector<16x64xbf16>
    %c0_i32 = arith.constant 0 : i32
    %2 = arith.index_cast %c0_i32 : i32 to index
    %c0_3 = arith.constant 0 : index
    %c0_4 = arith.constant 0 : index
    %3 = vector.load %arg1[%2, %c0_3, %c0_4] : memref<2x16x16xbf16, #tpu.memory_space<vmem>>, vector<1x16x16xbf16>
    %4 = vector.shape_cast %3 : vector<1x16x16xbf16> to vector<16x16xbf16>
    %cst = arith.constant dense<0.000000e+00> : vector<16x64xf32>
    %5 = tpu.matmul %4, %1, %cst {dimension_numbers = #tpu.dot_dimension_numbers<[1], [0], [0], [1], [0, 0, 1, 1], [], []>} : vector<16x16xbf16>, vector<16x64xbf16>, vector<16x64xf32> -> vector<16x64xf32>
    %cst_5 = arith.constant dense<0.000000e+00> : vector<64x64xf32>
    %6 = tpu.matmul %0, %5, %cst_5 {dimension_numbers = #tpu.dot_dimension_numbers<[1], [0], [0], [1], [0, 0, 1, 1], [], []>} : vector<64x16xf32>, vector<16x64xf32>, vector<64x64xf32> -> vector<64x64xf32>
    %cst_6 = arith.constant 0.000000e+00 : f32
    %7 = vector.broadcast %cst_6 : f32 to vector<64x64xf32>
    %8 = arith.cmpf ogt, %6, %7 : vector<64x64xf32>
    %9 = arith.extui %8 : vector<64x64xi1> to vector<64x64xi8>
    %10 = arith.index_cast %c0_i32 : i32 to index
    %c0_7 = arith.constant 0 : index
    %c0_8 = arith.constant 0 : index
    %11 = vector.load %arg4[%10, %c0_7, %c0_8] : memref<2x64x64xi8, #tpu.memory_space<vmem>>, vector<1x64x64xi8>
    %12 = vector.shape_cast %11 : vector<1x64x64xi8> to vector<64x64xi8>
    %13 = vector.shape_cast %9 : vector<64x64xi8> to vector<1x64x64xi8>
    tpu.vector_store %arg4[%10, %c0_7, %c0_8], %13 {strides = array<i32>} : memref<2x64x64xi8, #tpu.memory_space<vmem>>, vector<1x64x64xi8>,
    %c1_i32 = arith.constant 1 : i32
    %14 = arith.index_cast %c1_i32 : i32 to index
    %c0_9 = arith.constant 0 : index
    %c0_10 = arith.constant 0 : index
    %15 = vector.load %arg1[%14, %c0_9, %c0_10] : memref<2x16x16xbf16, #tpu.memory_space<vmem>>, vector<1x16x16xbf16>
    %16 = vector.shape_cast %15 : vector<1x16x16xbf16> to vector<16x16xbf16>
    %cst_11 = arith.constant dense<0.000000e+00> : vector<16x64xf32>
    %17 = tpu.matmul %16, %1, %cst_11 {dimension_numbers = #tpu.dot_dimension_numbers<[1], [0], [0], [1], [0, 0, 1, 1], [], []>} : vector<16x16xbf16>, vector<16x64xbf16>, vector<16x64xf32> -> vector<16x64xf32>
    %cst_12 = arith.constant dense<0.000000e+00> : vector<64x64xf32>
    %18 = tpu.matmul %0, %17, %cst_12 {dimension_numbers = #tpu.dot_dimension_numbers<[1], [0], [0], [1], [0, 0, 1, 1], [], []>} : vector<64x16xf32>, vector<16x64xf32>, vector<64x64xf32> -> vector<64x64xf32>
    %cst_13 = arith.constant 0.000000e+00 : f32
    %19 = vector.broadcast %cst_13 : f32 to vector<64x64xf32>
    %20 = arith.cmpf ogt, %18, %19 : vector<64x64xf32>
    %21 = arith.extui %20 : vector<64x64xi1> to vector<64x64xi8>
    %22 = arith.index_cast %c1_i32 : i32 to index
    %c0_14 = arith.constant 0 : index
    %c0_15 = arith.constant 0 : index
    %23 = vector.load %arg4[%22, %c0_14, %c0_15] : memref<2x64x64xi8, #tpu.memory_space<vmem>>, vector<1x64x64xi8>
    %24 = vector.shape_cast %23 : vector<1x64x64xi8> to vector<64x64xi8>
    %25 = vector.shape_cast %21 : vector<64x64xi8> to vector<1x64x64xi8>
    tpu.vector_store %arg4[%22, %c0_14, %c0_15], %25 {strides = array<i32>} : memref<2x64x64xi8, #tpu.memory_space<vmem>>, vector<1x64x64xi8>,
    %c2_i32 = arith.constant 2 : i32
    return
  }
  func.func @transform_0(%arg0: i32) -> (i32, i32, i32) {
    %c0_i32 = arith.constant 0 : i32
    %c0_i32_0 = arith.constant 0 : i32
    %c0_i32_1 = arith.constant 0 : i32
    return %arg0, %c0_i32, %c0_i32_0 : i32, i32, i32
  }
  func.func @transform_1(%arg0: i32) -> (i32, i32) {
    %c0_i32 = arith.constant 0 : i32
    %c0_i32_0 = arith.constant 0 : i32
    %c0_i32_1 = arith.constant 0 : i32
    return %c0_i32, %c0_i32_0 : i32, i32
  }
  func.func @transform_2(%arg0: i32) -> (i32, i32) {
    %c0_i32 = arith.constant 0 : i32
    %c0_i32_0 = arith.constant 0 : i32
    %c0_i32_1 = arith.constant 0 : i32
    return %c0_i32, %c0_i32_0 : i32, i32
  }
  func.func @transform_3(%arg0: i32) -> (i32, i32, i32) {
    %c0_i32 = arith.constant 0 : i32
    %c0_i32_0 = arith.constant 0 : i32
    %c0_i32_1 = arith.constant 0 : i32
    return %arg0, %c0_i32, %c0_i32_0 : i32, i32, i32
  }
}

</mosaic_0001>

<bundles_post_ra>
// kernel: tpu_custom_call.1
= control target key start
LH: loop header
LB: loop body
LE: loop exit
PB: predicated region body
PF: predicated region fallthrough
CT: control target
= control target key end

     0   :  { %8 = vsyncpa [#allocation3], 0  ;;  %s1065_s0 = inlined_call_operand.vmem [shape: bf16[8,16,16], index: 0, kind: input, shape index: {}]   ;;  %s1066_s1 = inlined_call_operand.vmem [shape: f32[64,16], index: 1, kind: input, shape index: {}]   ;;  %s1067_s2 = inlined_call_operand.vmem [shape: bf16[16,64], index: 2, kind: input, shape index: {}]   ;;  %s1068_s3 = inlined_call_operand.hbm [shape: s8[8,64,64], index: 3, kind: output, shape index: {}]  }
   0x1   :  { %10 = vsyncpa [#allocation3 + $0x1], 0  ;;  %s892_s12 = smov 0   ;;  %s894_s13 = smov 0  }
   0x2   :  { %s896_s14 = smov 0   ;;  %s898_s15 = smov 0  }
   0x3 LB: > { %s913_s16 = sadd.s32 4294967295, %s864_s15   ;;  %s647_s17 = sadd.s32 4294967294, %s864_s15   ;;  %s864_s15 = sphi %s898_s15, %s1078_s15   ;;  %s860_s14 = sphi %s896_s14, %s1077_s14   ;;  %s856_s13 = sphi %s894_s13, %s1076_s13   ;;  %s852_s12 = sphi %s892_s12, %s1075_s12  }
   0x4   : > { %s917_s18 = sadd.s32 1, %s864_s15   ;;  %s91_s19 = sadd.s32 1, %s860_s14 }
   0x5   : > { %s88_s20 = ssub.s32 %s864_s15, %s917_s18  ;;  %p101_p0 = scmp.ne.s32.totalorder %s860_s14, %s856_s13 }
   0x6   : > { %p89_p1 = scmp.eq.s32.totalorder %s88_s20, 0  ;;  %p102_p2 = scmp.eq.s32.totalorder %s913_s16, 3 }
   0x7   : > { %p107_p3 = scmp.ne.s32.totalorder %s856_s13, %s852_s12  ;;  %p108_p4 = scmp.eq.s32.totalorder %s647_s17, 3 }
   0x8   : > { %s928_s21 = scalar_select %p89_p1, %s860_s14, %s91_s19  }
   0x9   : > { %p930_p5 = por %p102_p2, %p101_p0  ;;  %p934_p6 = por %p108_p4, %p107_p3 }
   0xa   : > { %p650_p7 = scmp.ge.s32.totalorder %s864_s15, 1  ;;  %p142_p8 = scmp.lt.s32.totalorder %s864_s15, 5 }
   0xc   : > { %p143_p9 = pnand %p650_p7, %p142_p8 }
   0xd   : > { %s652_s26 = sshll.u32 (!%p143_p9), %s913_s16, 1  ;;  %s164_s29 = sand.u32 (!%p143_p9), 1, %s856_s13  }
   0xe   : > { %146 = sbr.rel (%p143_p9) target bundleno = 452 (0x1c4), region = 32  ;;  %p168_p10 = scmp.lt.s32.totalorder (!%p143_p9), %s652_s26, 7 }
   0xf   : > { %s688_s6 = sshll.u32 (!%p143_p9), %s913_s16, 9  ;;  %s1025_s16 = scalar_lea.sflag (!%p143_p9), [#allocation3], %s164_s29 }
  0x10   : > { %s1015_s9 = scalar_lea.hbm (!%p143_p9), %s1068_s3, %s688_s6  ;;  %s869_s11 = smov (!%p143_p9), [#allocation2]  }
  0x11   : > { %s808_s17 = sshll.u32 (!%p143_p9), %s869_s11, 4  ;;  %s809_s17 = int_to_ptr.vmem [resolvable:$false] %s808_s17 }
  0x12   : > { %s810_s19 = scalar_lea.vmem (!%p143_p9), %s809_s17, 1024 }
  0x13   : > { %v801_v0 = vld [vmem:[%s1067_s2] sm:$0xff]   ;;  %v866_v1 = vmov 0.0   ;;  %vm867_vm0 = vmmov 0   ;;  %s1080_s26 = smov (!%p168_p10, %s652_s26), 7  ;;  %vm201_vm1 = vcmask 130048   ;;  %v179_v12 = vld [vmem:[%s1066_s1 + $0x8] sm:$0xff] }
  0x14   : > { %713 = vmatprep.subr.bf16.mxu1 %v866_v1  ;;  %735 = vmatprep.subr.bf16.mxu0 %v866_v1  ;;  %s686_s27 = sshll.u32 %s1080_s26, 3  ;;  %v178_v4 = vld [vmem:[%s1066_s1] sm:$0xff]  ;;  %v180_v14 = vld [vmem:[%s1066_s1 + $0x10] sm:$0xff]  ;;  %v181_v15 = vld [vmem:[%s1066_s1 + $0x18] sm:$0xff]  ;;  %vm391_vm11 = vcmask 523264   ;;  %v868_v31 = vmov 0  }
  0x15   : > { %714 = vmatpush3.bf16.msra.mxu1 %v801_v0  ;;  %736 = vmatpush3.bf16.msra.mxu0 %v801_v0  ;;  %s172_s30 = scalar_lea.vmem %s1065_s0, %s686_s27  ;;  %v182_v16 = vld [vmem:[%s1066_s1 + $0x20] sm:$0xff]  ;;  %v183_v17 = vld [vmem:[%s1066_s1 + $0x28] sm:$0xff]  ;;  %v184_v18 = vld [vmem:[%s1066_s1 + $0x30] sm:$0xff] }
  0x16   : > { %715 = vmatprep.mubr.msk.bf16.mxu1 %vm867_vm0, %v866_v1  ;;  %737 = vmatprep.mubr.msk.bf16.mxu0 %vm867_vm0, %v866_v1  ;;  %v802_v2 = vld [vmem:[%s172_s30] sm:$0xff]   ;;  %v803_v3 = vld [vmem:[%s172_s30 + $0x8] sm:$0xff]   ;;  %v185_v19 = vld [vmem:[%s1066_s1 + $0x38] sm:$0xff]  ;;  %s651_s30 = sshll.u32 %s164_s29, 5 }
  0x17   : > { %s996_s4 = scalar_lea.vmem [#allocation2], %s651_s30 }
  0x18   : > { %716 = vmatmul.mubr.msk.bf16.vlgmr.msra.gmra.mxu1 %vm201_vm1, %v802_v2  ;;  %738 = vmatmul.mubr.msk.bf16.vlgmr.msra.gmra.mxu0 %vm201_vm1, %v803_v3  ;;  %s585_s5 = sshll.u32 %s996_s4, 4  ;;  %s1010_s5 = int_to_ptr.vmem [resolvable:$true] %s585_s5 }
  0x19   : > { %723 = vmatprep.mubr.msk.f32.mxu1 %vm201_vm1, %v178_v4  ;;  %745 = vmatprep.mubr.msk.f32.mxu0 %vm201_vm1, %v178_v4  ;;  %s804_s10 = scalar_lea.vmem %s1010_s5, 512  ;;  %p811_p0 = scmp.lt.s32.totalorder %s1010_s5, %s809_s17 }
  0x1a   : > { %p805_p11 = scmp.ne.s32.totalorder %s1010_s5, %s804_s10  ;;  %p812_p1 = scmp.lt.s32.totalorder %s810_s19, %s804_s10 }
  0x1c   : > { %p806_p12 = pnand %p805_p11, %p930_p5  ;;  %p813_p2 = por %p812_p1, %p811_p0 }
  0x1e   : > { %p807_p13 = pneg %p806_p12 }
  0x20   : > { %p814_p3 = pnand %p813_p2, %p807_p13 }
  0xd8   : > { %v239_v5 = vpop.f32.mrf.mxu1  ;;  %v439_v6 = vpop.f32.mrf.mxu0 }
  0xda   : > { %v717_v7 = vpop.f32.mrf.mxu1  ;;  %v739_v8 = vpop.f32.mrf.mxu0 }
  0xdc   : > { %v242_v9 = vpop.f32.mrf.mxu1  ;;  %v442_v10 = vpop.f32.mrf.mxu0 }
  0xdd   : > { %719 = vmatprep.subr.mxu1 %v242_v9  ;;  %741 = vmatprep.subr.mxu0 %v442_v10 }
  0xde   : > { %v718_v11 = vpop.f32.mrf.mxu1  ;;  %720 = vmatpush3.msra.mxu1 %v242_v9  ;;  %v740_v13 = vpop.f32.mrf.mxu0  ;;  %742 = vmatpush3.msra.mxu0 %v442_v10 }
  0xdf   : > { %721 = vmatprep.subr.mxu1 %v239_v5  ;;  %743 = vmatprep.subr.mxu0 %v439_v6 }
  0xe0   : > { %722 = vmatpush3.msra.mxu1 %v239_v5  ;;  %744 = vmatpush3.msra.mxu0 %v439_v6 }
  0xe1   : > { %724 = vmatmul.mubr.msk.f32.vlgmr.msra.gmra.mxu1 %vm201_vm1, %v179_v12  ;;  %746 = vmatmul.mubr.msk.f32.vlgmr.msra.gmra.mxu0 %vm201_vm1, %v179_v12 }
  0xe2   : > { %726 = vmatprep.mubr.msk.f32.mxu1 %vm201_vm1, %v180_v14  ;;  %748 = vmatprep.mubr.msk.f32.mxu0 %vm201_vm1, %v180_v14 }
  0xe5   : > { %727 = vmatmul.mubr.msk.f32.gmra.mxu1 %vm201_vm1, %v181_v15  ;;  %749 = vmatmul.mubr.msk.f32.gmra.mxu0 %vm201_vm1, %v181_v15 }
  0xe6   : > { %729 = vmatprep.mubr.msk.f32.mxu1 %vm201_vm1, %v182_v16  ;;  %751 = vmatprep.mubr.msk.f32.mxu0 %vm201_vm1, %v182_v16 }
  0xe9   : > { %730 = vmatmul.mubr.msk.f32.gmra.mxu1 %vm201_vm1, %v183_v17  ;;  %752 = vmatmul.mubr.msk.f32.gmra.mxu0 %vm201_vm1, %v183_v17 }
  0xea   : > { %732 = vmatprep.mubr.msk.f32.mxu1 %vm201_vm1, %v184_v18  ;;  %754 = vmatprep.mubr.msk.f32.mxu0 %vm201_vm1, %v184_v18 }
  0xed   : > { %733 = vmatmul.mubr.msk.f32.gmra.mxu1 %vm201_vm1, %v185_v19  ;;  %755 = vmatmul.mubr.msk.f32.gmra.mxu0 %vm201_vm1, %v185_v19 }
 0x1a1   : > { %v725_v20 = vpop.f32.mrf.mxu1  ;;  %v747_v21 = vpop.f32.mrf.mxu0 }
 0x1a2   : > { %vm376_vm4 = vcmp.gt.f32.partialorder %v725_v20, 0.0  ;;  %vm552_vm5 = vcmp.gt.f32.partialorder %v747_v21, 0.0 }
 0x1a3   : > { %v336_v22 = vpop.f32.mrf.mxu1  ;;  %v512_v23 = vpop.f32.mrf.mxu0 }
 0x1a4   : > { %vm375_vm2 = vcmp.gt.f32.partialorder %v336_v22, 0.0  ;;  %vm551_vm3 = vcmp.gt.f32.partialorder %v512_v23, 0.0 }
 0x1a5   : > { %v728_v24 = vpop.f32.mrf.mxu1  ;;  %v750_v25 = vpop.f32.mrf.mxu0  ;;  %vm383_vm6 = vmpackc.low %vm376_vm4, %vm375_vm2 }
 0x1a6   : > { %vm992_vm7 = vmpackc.low %vm552_vm5, %vm551_vm3  ;;  %vm378_vm8 = vcmp.gt.f32.partialorder %v728_v24, 0.0  ;;  %vm554_vm13 = vcmp.gt.f32.partialorder %v750_v25, 0.0 }
 0x1a7   : > { %v346_v26 = vpop.f32.mrf.mxu1  ;;  %v522_v28 = vpop.f32.mrf.mxu0 }
 0x1a8   : > { %vm377_vm9 = vcmp.gt.f32.partialorder %v346_v26, 0.0  ;;  %vm553_vm12 = vcmp.gt.f32.partialorder %v522_v28, 0.0 }
 0x1a9   : > { %vm384_vm10 = vmpackc.low %vm378_vm8, %vm377_vm9  ;;  %v731_v29 = vpop.f32.mrf.mxu1  ;;  %v753_v30 = vpop.f32.mrf.mxu0 }
 0x1aa   : > { %vm385_vm14 = vmpackc.even %vm384_vm10, %vm383_vm6  ;;  %vm380_vm3 = vcmp.gt.f32.partialorder %v731_v29, 0.0  ;;  %vm556_vm4 = vcmp.gt.f32.partialorder %v753_v30, 0.0 }
 0x1ab   : > { %v389_v32 = vsel %vm385_vm14, 16843009, %v868_v31  ;;  %vm560_vm15 = vmpackc.low %vm554_vm13, %vm553_vm12  ;;  %v356_v33 = vpop.f32.mrf.mxu1  ;;  %v532_v34 = vpop.f32.mrf.mxu0 }
 0x1ac   : > { %392 = vst.msk [vmem:[%s996_s4] sm:$0xff] %vm391_vm11, %v389_v32  ;;  %vm561_vm0 = vmpackc.even %vm560_vm15, %vm992_vm7  ;;  %vm379_vm1 = vcmp.gt.f32.partialorder %v356_v33, 0.0  ;;  %vm555_vm2 = vcmp.gt.f32.partialorder %v532_v34, 0.0 }
 0x1ad   : > { %v565_v35 = vsel %vm561_vm0, 16843009, %v868_v31  ;;  %v734_v36 = vpop.f32.mrf.mxu1  ;;  %v756_v37 = vpop.f32.mrf.mxu0  ;;  %vm386_vm5 = vmpackc.low %vm380_vm3, %vm379_vm1 }
 0x1ae   : > { %678 = vst.msk [vmem:[%s996_s4 + $0x10] sm:$0xff] %vm391_vm11, %v565_v35  ;;  %vm1005_vm6 = vmpackc.low %vm556_vm4, %vm555_vm2  ;;  %vm382_vm7 = vcmp.gt.f32.partialorder %v734_v36, 0.0  ;;  %vm558_vm12 = vcmp.gt.f32.partialorder %v756_v37, 0.0 }
 0x1af   : > { %v366_v38 = vpop.f32.mrf.mxu1  ;;  %v542_v40 = vpop.f32.mrf.mxu0 }
 0x1b0   : > { %vm381_vm8 = vcmp.gt.f32.partialorder %v366_v38, 0.0  ;;  %vm557_vm10 = vcmp.gt.f32.partialorder %v542_v40, 0.0 }
 0x1b1   : > { %vm387_vm9 = vmpackc.low %vm382_vm7, %vm381_vm8 }
 0x1b2   : > { %vm388_vm13 = vmpackc.even %vm387_vm9, %vm386_vm5 }
 0x1b3   : > { %v390_v41 = vsel %vm388_vm13, 16843009, %v868_v31  ;;  %vm563_vm14 = vmpackc.low %vm558_vm12, %vm557_vm10 }
 0x1b4   : > { %393 = vst.msk [vmem:[%s996_s4 + $0x8] sm:$0xff] %vm391_vm11, %v390_v41  ;;  %vm564_vm15 = vmpackc.even %vm563_vm14, %vm1005_vm6 }
 0x1b5   : > { %v566_v42 = vsel %vm564_vm15, 16843009, %v868_v31 }
 0x1b6   : > { %679 = vst.msk [vmem:[%s996_s4 + $0x18] sm:$0xff] %vm391_vm11, %v566_v42 }
 0x1b7   : > { %817 = shalt.err (!%p814_p3)
}
 0x1b8   : > { %s818_s20 = scalar_lea.hbm %s1015_s9, 512  ;;  %s822_s26 = scalar_lea.hbm %s1068_s3, 2048 }
 0x1b9   : > { %p819_p4 = scmp.ne.s32.totalorder %s1015_s9, %s818_s20  ;;  %p823_p9 = scmp.lt.s32.totalorder %s1015_s9, %s1068_s3 }
 0x1ba   : > { %p824_p10 = scmp.lt.s32.totalorder %s822_s26, %s818_s20 }
 0x1bb   : > { %p820_p7 = pnand %p819_p4, %p930_p5 }
 0x1bc   : > { %p825_p11 = por %p824_p10, %p823_p9 }
 0x1bd   : > { %p821_p8 = pneg %p820_p7 }
 0x1bf   : > { %p826_p12 = pnand %p825_p11, %p821_p8 }
 0x1c1   : > { %829 = shalt.err (!%p826_p12)
}
 0x1c2   : > { %s870_s29 = smov 128   ;;  %s871_s30 = smov 8  }
 0x1c3   : > { %757 = dma.vmem_to_hbm [thread:$0]  (%p930_p5), %s1010_s5, 512, %s1015_s9, %s1025_s16, %s870_s29, %s870_s29, %s871_s30  }
 0x1c4 PF: > { %p763_p13 = scmp.ge.s32.totalorder %s864_s15, 2  ;;  %s600_s4 = sand.u32 1, %s852_s12  }
 0x1c5   : > { %s601_s6 = scalar_lea.sflag [#allocation3], %s600_s4 }
 0x1c6   : > { %p760_p0 = pnand %p763_p13, %p934_p6 }
 0x1c8   : > { %p761_p1 = pneg %p760_p0 }
 0x1ca   : > { %847 = dma.done.wait (%p761_p1), %s601_s6, 512  }
 0x1cb   : > { %849 = vsyncadd (%p761_p1), %s601_s6, 4294966784  ;;  %p13_p2 = scmp.ge.s32.totalorder %s917_s18, 6   ;;  %s1075_s12 = smov %s856_s13 }
 0x1cc   : > { %s1076_s13 = smov %s860_s14  ;;  %s1077_s14 = smov %s928_s21 }
 0x1cd   : > { %s1078_s15 = smov %s917_s18  ;;  %15 = sbr.rel (!%p13_p2) target bundleno = 3 (0x3), region = 69 }
 0x1d2   :  { %606 = vsyncpa [#allocation3], 1 }
 0x1d3   :  { %608 = vsyncpa [#allocation3 + $0x1], 1 }

</bundles_post_ra>
